<compile_context>
chip_gen: v5e
topology: v5e:2x2
jax: 0.10.0
libtpu: 0.0.40
codegen_flags: <defaults>
</compile_context>

<pallas_src>
import functools

import jax
import jax.numpy as jnp
from jax import lax
from jax.experimental import pallas as pl
from jax.experimental.pallas import tpu as pltpu


# ----------------------------------------------------------------------------
# Tile sizing helpers
# ----------------------------------------------------------------------------
def _sublane_multiple(dtype):
    # Native sublane packing: 8 rows for 32-bit, 16 for 16-bit, 32 for 8-bit.
    return max(8, 32 // jnp.dtype(dtype).itemsize)


def _legalize_tile_c(tile_c, c, sub):
    if tile_c >= c:
        return c  # full extent is always a legal block dim
    return max(sub, (tile_c // sub) * sub)


def _pick_tile_c(c, t, dtype):
    itemsize = jnp.dtype(dtype).itemsize
    sub = _sublane_multiple(dtype)
    # ~1.5 MiB input blocks: HBM streaming saturates near ~1 MiB tiles, and the
    # kernel body keeps ~3 extra f32 tile-sized temporaries live, so bigger
    # blocks only add VMEM pressure without any bandwidth gain.
    target_bytes = 3 << 19  # 1.5 MiB
    tile_c = max(sub, (target_bytes // max(t * itemsize, 1)) // sub * sub)

    # v7x occupancy: keep the channel grid at >= 2 (ideally >= 4) blocks when C
    # allows, so ("parallel",) semantics can shard blocks across both TCs.
    if c >= 4 * sub:
        min_blocks = 4
    elif c >= 2 * sub:
        min_blocks = 2
    else:
        min_blocks = 1
    if min_blocks > 1:
        cap = (-(-c // min_blocks) + sub - 1) // sub * sub
        tile_c = min(tile_c, cap)
    return _legalize_tile_c(tile_c, c, sub)


def _vmem_limit(tile_c, tile_t, itemsize):
    # in/out double buffers + ~3 f32 tile-sized body temporaries + margin.
    need = 4 * tile_c * tile_t * itemsize + 3 * tile_c * tile_t * 4 + (2 << 20)
    return int(min(max(need, 16 << 20), 64 << 20))


# ----------------------------------------------------------------------------
# Single-pass path: a full row (channel) fits in VMEM.
# ----------------------------------------------------------------------------
def _normalize_kernel(x_ref, o_ref):
    # One (tile_c, T) tile; reduce over the time (lane) axis per row.
    x = x_ref[...].astype(jnp.float32)
    t = x.shape[-1]
    mean = jnp.mean(x, axis=-1, keepdims=True)
    centered = x - mean
    # torch.std default: unbiased (Bessel's correction). Two-pass centered form
    # avoids E[x^2]-mean^2 cancellation. T == 1 yields NaN, matching torch.
    var = jnp.sum(centered * centered, axis=-1, keepdims=True) / (t - 1)
    inv_std = lax.rsqrt(var)  # EUP rsqrt -> per-element multiply, not divide
    o_ref[...] = (centered * inv_std).astype(o_ref.dtype)


def _normalize_single_pass(x, tile_c=None):
    c, t = x.shape
    itemsize = jnp.dtype(x.dtype).itemsize
    sub = _sublane_multiple(x.dtype)
    if tile_c is None:
        tile_c = _pick_tile_c(c, t, x.dtype)
    else:
        tile_c = _legalize_tile_c(int(tile_c), c, sub)

    grid = (pl.cdiv(c, tile_c),)
    return pl.pallas_call(
        _normalize_kernel,
        out_shape=jax.ShapeDtypeStruct((c, t), x.dtype),
        grid=grid,
        # Full T extent per block: the per-row reduction stays within one tile
        # and the output stores are lane-dense.
        in_specs=[pl.BlockSpec((tile_c, t), lambda i: (i, 0))],
        out_specs=pl.BlockSpec((tile_c, t), lambda i: (i, 0)),
        compiler_params=pltpu.CompilerParams(
            dimension_semantics=("parallel",),
            vmem_limit_bytes=_vmem_limit(tile_c, t, itemsize),
        ),
    )(x)


# ----------------------------------------------------------------------------
# Two-pass path: T-tiled reduction for rows too long for VMEM.
# ----------------------------------------------------------------------------
def _stats_kernel(x_ref, mean_ref, inv_std_ref, sum_sc, sumsq_sc, *, t_total):
    tj = pl.program_id(1)

    @pl.when(tj == 0)
    def _():
        sum_sc[...] = jnp.zeros_like(sum_sc)
        sumsq_sc[...] = jnp.zeros_like(sumsq_sc)

    x = x_ref[...].astype(jnp.float32)
    tile_t = x.shape[-1]
    # Mask out-of-bounds time columns in a possibly-partial last T block.
    col = tj * tile_t + lax.broadcasted_iota(jnp.int32, x.shape, x.ndim - 1)
    xz = jnp.where(col < t_total, x, 0.0)
    sum_sc[...] += jnp.sum(xz, axis=-1, keepdims=True)
    sumsq_sc[...] += jnp.sum(xz * xz, axis=-1, keepdims=True)

    @pl.when(tj == pl.num_programs(1) - 1)
    def _():
        n = jnp.float32(t_total)
        mean = sum_sc[...] / n
        # One-pass variance: accepted cancellation tradeoff for the long-T
        # fallback only (the main path keeps the two-pass centered form).
        var = (sumsq_sc[...] - n * mean * mean) / (n - 1.0)
        mean_ref[...] = mean
        inv_std_ref[...] = lax.rsqrt(var)


def _apply_kernel(x_ref, mean_ref, inv_std_ref, o_ref):
    x = x_ref[...].astype(jnp.float32)
    o_ref[...] = ((x - mean_ref[...]) * inv_std_ref[...]).astype(o_ref.dtype)


def _normalize_two_pass(x, tile_c=None, tile_t=None):
    c, t = x.shape
    itemsize = jnp.dtype(x.dtype).itemsize
    sub = _sublane_multiple(x.dtype)

    if tile_t is None:
        tile_t = 2048
    if tile_t >= t or t <= 128:
        tile_t = t  # full extent always legal
    else:
        tile_t = max(128, (min(int(tile_t), t) // 128) * 128)

    if tile_c is None:
        target_bytes = 3 << 19
        tile_c = max(sub, (target_bytes // max(tile_t * itemsize, 1)) // sub * sub)
    tile_c = _legalize_tile_c(int(tile_c), c, sub)

    grid = (pl.cdiv(c, tile_c), pl.cdiv(t, tile_t))
    vmem_limit = _vmem_limit(tile_c, tile_t, itemsize)

    # Pass 1: per-channel mean and inverse std, reducing over the T axis.
    mean, inv_std = pl.pallas_call(
        functools.partial(_stats_kernel, t_total=t),
        out_shape=(jax.ShapeDtypeStruct((c, 1), jnp.float32),
                   jax.ShapeDtypeStruct((c, 1), jnp.float32)),
        grid=grid,
        in_specs=[pl.BlockSpec((tile_c, tile_t), lambda i, j: (i, j))],
        out_specs=(pl.BlockSpec((tile_c, 1), lambda i, j: (i, 0)),
                   pl.BlockSpec((tile_c, 1), lambda i, j: (i, 0))),
        scratch_shapes=[pltpu.VMEM((tile_c, 1), jnp.float32),
                        pltpu.VMEM((tile_c, 1), jnp.float32)],
        compiler_params=pltpu.CompilerParams(
            dimension_semantics=("parallel", "arbitrary"),
            vmem_limit_bytes=vmem_limit,
        ),
    )(x)

    # Pass 2: stream x again and apply (x - mean) * inv_std.
    return pl.pallas_call(
        _apply_kernel,
        out_shape=jax.ShapeDtypeStruct((c, t), x.dtype),
        grid=grid,
        in_specs=[pl.BlockSpec((tile_c, tile_t), lambda i, j: (i, j)),
                  pl.BlockSpec((tile_c, 1), lambda i, j: (i, 0)),
                  pl.BlockSpec((tile_c, 1), lambda i, j: (i, 0))],
        out_specs=pl.BlockSpec((tile_c, tile_t), lambda i, j: (i, j)),
        compiler_params=pltpu.CompilerParams(
            dimension_semantics=("parallel", "parallel"),
            vmem_limit_bytes=vmem_limit,
        ),
    )(x, mean, inv_std)


# ----------------------------------------------------------------------------
# Public entry point
# ----------------------------------------------------------------------------
def normalize_multichannel_timeseries(x, tile_c=None, tile_t=None,
                                      force_two_pass=False):
    """x: (C, T). Per-channel zero-mean / unit-(unbiased)std normalization."""
    c, t = x.shape
    itemsize = jnp.dtype(x.dtype).itemsize
    sub = _sublane_multiple(x.dtype)
    # A minimal single-pass row block is (sublane_mult, T): in/out double
    # buffers plus ~3 f32 tile temps. If that can't fit comfortably (v7x's
    # 64 MiB VMEM is the tightest), fall back to the T-tiled two-pass path.
    min_row_block_bytes = 4 * sub * t * itemsize + 3 * sub * t * 4
    if force_two_pass or tile_t is not None or min_row_block_bytes > (24 << 20):
        return _normalize_two_pass(x, tile_c=tile_c, tile_t=tile_t)
    return _normalize_single_pass(x, tile_c=tile_c)


# ----------------------------------------------------------------------------
# Reference + self-test
# ----------------------------------------------------------------------------
def _reference(x):
    xf = x.astype(jnp.float32)
    mean = jnp.mean(xf, axis=1, keepdims=True)
    std = jnp.std(xf, axis=1, keepdims=True, ddof=1)  # unbiased, like torch.std
    return ((xf - mean) / std).astype(x.dtype)


if __name__ == "__main__":
    key = jax.random.PRNGKey(0)
    C, T = 16, 256  # small multi-channel time series
    x = jax.random.normal(key, (C, T), dtype=jnp.float32) * 3.0 + 1.5
    ref = _reference(x)

    # Auto-tiled single-pass path (2 channel blocks: exercises pipelining).
    out = jax.block_until_ready(normalize_multichannel_timeseries(x))
    assert jnp.allclose(out, ref, atol=1e-5, rtol=1e-5), "mismatch (auto tile)"

    # Explicit channel tile.
    out_tiled = jax.block_until_ready(normalize_multichannel_timeseries(x, tile_c=8))
    assert jnp.allclose(out_tiled, ref, atol=1e-5, rtol=1e-5), "mismatch (tile_c=8)"

    # Force the long-T two-pass fallback (stats + apply kernels) at small size.
    out_2p = jax.block_until_ready(
        normalize_multichannel_timeseries(x, tile_t=128, force_two_pass=True))
    assert jnp.allclose(out_2p, ref, atol=1e-4, rtol=1e-4), "mismatch (two-pass)"

    # bf16 exercises the 16-row native sublane-multiple tile rounding.
    xb = x.astype(jnp.bfloat16)
    out_b = jax.block_until_ready(normalize_multichannel_timeseries(xb, tile_c=16))
    assert jnp.allclose(out_b.astype(jnp.float32),
                        _reference(xb).astype(jnp.float32),
                        atol=3e-2, rtol=3e-2), "mismatch (bf16)"

    print("KERNEL_OK")
</pallas_src>

<mosaic_0001>
module attributes {stable_mosaic.version = 11 : i64} {
  func.func @_normalize_kernel(%arg0: i32, %arg1: memref<8x256xf32, #tpu.memory_space<vmem>>, %arg2: memref<8x256xf32, #tpu.memory_space<vmem>>) attributes {dimension_semantics = [#tpu.dimension_semantics<parallel>], iteration_bounds = array<i64: 2>, scalar_prefetch = 0 : i64, scratch_operands = 0 : i64, tpu.core_type = #tpu.core_type<tc>, window_params = [{transform_indices = @transform_0, window_bounds = array<i64: 8, 256>}, {transform_indices = @transform_1, window_bounds = array<i64: 8, 256>}]} {
    %c0 = arith.constant 0 : index
    %c0_0 = arith.constant 0 : index
    %0 = vector.load %arg1[%c0, %c0_0] : memref<8x256xf32, #tpu.memory_space<vmem>>, vector<8x256xf32>
    %cst = arith.constant dense<0.000000e+00> : vector<8xf32>
    %1 = vector.multi_reduction <add>, %0, %cst [1] : vector<8x256xf32> to vector<8xf32>
    %2 = vector.shape_cast %1 : vector<8xf32> to vector<8x1xf32>
    %cst_1 = arith.constant 2.560000e+02 : f32
    %3 = vector.broadcast %cst_1 : f32 to vector<8x1xf32>
    %4 = arith.divf %2, %3 : vector<8x1xf32>
    %5 = vector.broadcast %4 : vector<8x1xf32> to vector<8x256xf32>
    %6 = arith.subf %0, %5 : vector<8x256xf32>
    %7 = arith.mulf %6, %6 : vector<8x256xf32>
    %cst_2 = arith.constant dense<0.000000e+00> : vector<8xf32>
    %8 = vector.multi_reduction <add>, %7, %cst_2 [1] : vector<8x256xf32> to vector<8xf32>
    %9 = vector.shape_cast %8 : vector<8xf32> to vector<8x1xf32>
    %cst_3 = arith.constant 2.550000e+02 : f32
    %10 = vector.broadcast %cst_3 : f32 to vector<8x1xf32>
    %11 = arith.divf %9, %10 : vector<8x1xf32>
    %12 = math.rsqrt %11 : vector<8x1xf32>
    %13 = vector.broadcast %12 : vector<8x1xf32> to vector<8x256xf32>
    %14 = arith.mulf %6, %13 : vector<8x256xf32>
    %c0_4 = arith.constant 0 : index
    %c0_5 = arith.constant 0 : index
    %15 = vector.load %arg2[%c0_4, %c0_5] : memref<8x256xf32, #tpu.memory_space<vmem>>, vector<8x256xf32>
    tpu.vector_store %arg2[%c0_4, %c0_5], %14 {strides = array<i32>} : memref<8x256xf32, #tpu.memory_space<vmem>>, vector<8x256xf32>,
    return
  }
  func.func @transform_0(%arg0: i32) -> (i32, i32) {
    %c0_i32 = arith.constant 0 : i32
    %c0_i32_0 = arith.constant 0 : i32
    return %arg0, %c0_i32 : i32, i32
  }
  func.func @transform_1(%arg0: i32) -> (i32, i32) {
    %c0_i32 = arith.constant 0 : i32
    %c0_i32_0 = arith.constant 0 : i32
    return %arg0, %c0_i32 : i32, i32
  }
}

</mosaic_0001>

<bundles_post_ra>
// kernel: tpu_custom_call.1
= control target key start
LH: loop header
LB: loop body
LE: loop exit
PB: predicated region body
PF: predicated region fallthrough
CT: control target
= control target key end

     0   :  { %6 = vsyncpa [#allocation3], 0  ;;  %s575_s0 = inlined_call_operand.hbm [shape: f32[16,256], index: 0, kind: input, shape index: {}]   ;;  %s576_s1 = inlined_call_operand.hbm [shape: f32[16,256], index: 1, kind: output, shape index: {}]  }
   0x1   :  { %8 = vsyncpa [#allocation3 + $0x1], 0 }
   0x2   :  { %9 = vsyncpa [#allocation4], 0 }
   0x3   :  { %11 = vsyncpa [#allocation4 + $0x1], 0  ;;  %s444_s6 = smov 0   ;;  %s446_s7 = smov 0  }
   0x4   :  { %s448_s8 = smov 0   ;;  %s450_s9 = smov 0  }
   0x5 LB: > { %s465_s10 = sadd.s32 4294967295, %s430_s9   ;;  %s264_s11 = sadd.s32 4294967294, %s430_s9   ;;  %s430_s9 = sphi %s450_s9, %s586_s9   ;;  %s426_s8 = sphi %s448_s8, %s585_s8   ;;  %s422_s7 = sphi %s446_s7, %s584_s7   ;;  %s418_s6 = sphi %s444_s6, %s583_s6  }
   0x6   : > { %s469_s12 = sadd.s32 1, %s430_s9   ;;  %s24_s13 = sadd.s32 1, %s426_s8 }
   0x7   : > { %s21_s14 = ssub.s32 %s430_s9, %s469_s12  ;;  %p31_p0 = scmp.ne.s32.totalorder %s426_s8, %s422_s7 }
   0x8   : > { %p22_p1 = scmp.eq.s32.totalorder %s21_s14, 0  ;;  %p32_p2 = scmp.eq.s32.totalorder %s430_s9, 0 }
   0x9   : > { %p37_p3 = scmp.ne.s32.totalorder %s422_s7, %s418_s6  ;;  %p38_p4 = scmp.eq.s32.totalorder %s465_s10, 0 }
   0xa   : > { %s481_s15 = scalar_select %p22_p1, %s426_s8, %s24_s13  }
   0xb   : > { %p483_p5 = por %p32_p2, %p31_p0  ;;  %p487_p6 = por %p38_p4, %p37_p3 }
   0xc   : > { %p61_p7 = scmp.eq.s32.totalorder %s465_s10, 1  ;;  %p67_p8 = scmp.eq.s32.totalorder %s264_s11, 1 }
   0xd   : > { %p292_p10 = scmp.lt.s32.totalorder %s430_s9, 2  ;;  %s87_s20 = sand.u32 1, %s426_s8  }
   0xe   : > { %p494_p11 = por %p61_p7, %p31_p0  ;;  %p498_p12 = por %p67_p8, %p37_p3 }
   0xf   : > { %s278_s21 = sshll.u32 %s430_s9, 4  ;;  %s267_s22 = sshll.u32 %s87_s20, 4 }
  0x10   : > { %s96_s25 = scalar_lea.hbm %s575_s0, %s278_s21  ;;  %s91_s27 = scalar_lea.vmem [#allocation2], %s267_s22 }
  0x11   : > { %s98_s26 = sshll.u32 %s96_s25, 4  ;;  %s100_s28 = sshll.u32 %s91_s27, 4  ;;  %s99_s26 = int_to_ptr.hbm [resolvable:$true] %s98_s26  ;;  %s101_s28 = int_to_ptr.vmem [resolvable:$true] %s100_s28 }
  0x12   : > { %p509_p13 = pnand %p292_p10, %p483_p5  ;;  %p270_p0 = scmp.ge.s32.totalorder %s430_s9, 1 }
  0x13   : > { %p105_p1 = scmp.lt.s32.totalorder %s430_s9, 3  ;;  %s88_s30 = scalar_lea.sflag [#allocation3], %s87_s20 }
  0x14   : > { %s334_s2 = sshra.s32 %s99_s26, 4  ;;  %p338_p3 = pneg %p509_p13  ;;  %s335_s2 = int_to_ptr.hbm [resolvable:$true] %s334_s2 }
  0x15   : > { %s336_s3 = scalar_lea.hbm %s335_s2, 16  ;;  %s341_s11 = scalar_lea.hbm %s575_s0, 32 }
  0x16   : > { %p337_p2 = scmp.ne.s32.totalorder %s335_s2, %s336_s3  ;;  %p342_p5 = scmp.lt.s32.totalorder %s335_s2, %s575_s0 }
  0x17   : > { %p343_p8 = scmp.lt.s32.totalorder %s341_s11, %s336_s3 }
  0x18   : > { %p339_p4 = pnand %p338_p3, %p337_p2 }
  0x19   : > { %p344_p10 = por %p343_p8, %p342_p5 }
  0x1a   : > { %p340_p7 = pneg %p339_p4 }
  0x1c   : > { %p345_p9 = pnand %p344_p10, %p340_p7 }
  0x1e   : > { %348 = shalt.err (!%p345_p9)
}
  0x1f   : > { %287 = dma.hbm_to_vmem [thread:$0]  (!%p509_p13), %s99_s26, 256, %s101_s28, %s88_s30  }
  0x20   : > { %p106_p2 = pnand %p270_p0, %p105_p1 }
  0x21   : > { %s530_s16 = sand.u32 (!%p106_p2), 1, %s422_s7  }
  0x22   : > { %109 = sbr.rel (%p106_p2) target bundleno = 309 (0x135), region = 24  ;;  %s271_s20 = sshll.u32 (!%p106_p2), %s530_s16, 4 }
  0x23   : > { %s112_s21 = scalar_lea.sflag (!%p106_p2), [#allocation3], %s530_s16  ;;  %s115_s22 = scalar_lea.vmem (!%p106_p2), [#allocation2], %s271_s20 }
  0x27   : > { %409 = dma.done.wait (%p487_p6), %s112_s21, 256  }
  0x28   : > { %411 = vsyncadd (%p487_p6), %s112_s21, 4294967040  ;;  %v135_v0 = vld [vmem:[%s115_s22] sm:$0xff]  ;;  %v136_v1 = vld [vmem:[%s115_s22 + $0x8] sm:$0xff]  ;;  %v432_v3 = vmov 256.0   ;;  %v433_v17 = vmov 255.0   ;;  %s279_s17 = sshll.u32 %s465_s10, 4 }
  0x29   : > { %v137_v2 = vadd.f32 %v136_v1, %v135_v0  ;;  %328 = vrcp.f32 %v432_v3  ;;  %s189_s25 = scalar_lea.hbm %s576_s1, %s279_s17  ;;  %s134_s26 = scalar_lea.vmem [#allocation5], %s271_s20 }
  0x2a   : > { %330 = vrcp.f32 %v433_v17  ;;  %s191_s27 = sshll.u32 %s134_s26, 4  ;;  %s193_s28 = sshll.u32 %s189_s25, 4  ;;  %s192_s27 = int_to_ptr.vmem [resolvable:$true] %s191_s27  ;;  %s194_s28 = int_to_ptr.hbm [resolvable:$true] %s193_s28 }
  0x2b   : > { %138 = vadd.xlane.f32.xlu0 %v137_v2  ;;  %s178_s10 = scalar_lea.sflag [#allocation4], %s530_s16  ;;  %s378_s29 = sshra.s32 %s194_s28, 4  ;;  %s379_s29 = int_to_ptr.hbm [resolvable:$true] %s378_s29 }
  0x2c   : > { %s380_s30 = scalar_lea.hbm %s379_s29, 16  ;;  %s384_s4 = scalar_lea.hbm %s576_s1, 32 }
  0x2d   : > { %p381_p6 = scmp.ne.s32.totalorder %s379_s29, %s380_s30  ;;  %p385_p0 = scmp.lt.s32.totalorder %s379_s29, %s576_s1 }
  0x2e   : > { %p386_p1 = scmp.lt.s32.totalorder %s384_s4, %s380_s30 }
  0x2f   : > { %v329_v4 = vpop.eup %328  ;;  %p382_p9 = pnand %p381_p6, %p494_p11 }
  0x30   : > { %v141_v5 = vmul.f32 256.0, %v329_v4  ;;  %vm145_vm0 = vweird.f32 %v329_v4  ;;  %v331_v18 = vpop.eup %330  ;;  %p387_p3 = por %p386_p1, %p385_p0 }
  0x31   : > { %v156_v19 = vmul.f32 255.0, %v331_v18  ;;  %vm160_vm1 = vweird.f32 %v331_v18  ;;  %p383_p13 = pneg %p382_p9 }
  0x32   : > { %v142_v6 = vsub.f32 1.0, %v141_v5 }
  0x33   : > { %v157_v20 = vsub.f32 1.0, %v156_v19  ;;  %p388_p4 = pnand %p387_p3, %p383_p13 }
  0x34   : > { %v143_v7 = vmul.f32 %v329_v4, %v142_v6 }
  0x35   : > { %v158_v21 = vmul.f32 %v331_v18, %v157_v20 }
  0x36   : > { %v144_v8 = vadd.f32 %v329_v4, %v143_v7 }
  0x37   : > { %v159_v22 = vadd.f32 %v331_v18, %v158_v21 }
  0x38   : > { %v146_v9 = vsel %vm145_vm0, %v329_v4, %v144_v8 }
  0x39   : > { %v161_v23 = vsel %vm160_vm1, %v331_v18, %v159_v22 }
  0x9e   : > { %v139_v10 = vpop.xlane.xlu0 %138 }
  0x9f   : > { %v147_v11 = vmul.f32 %v146_v9, %v139_v10 }
  0xa1   : > { %v148_v12 = vsub.f32 %v135_v0, %v147_v11  ;;  %v149_v13 = vsub.f32 %v136_v1, %v147_v11 }
  0xa3   : > { %v150_v14 = vmul.f32 %v148_v12, %v148_v12  ;;  %v151_v15 = vmul.f32 %v149_v13, %v149_v13 }
  0xa5   : > { %v152_v16 = vadd.f32 %v151_v15, %v150_v14 }
  0xa7   : > { %153 = vadd.xlane.f32.xlu0 %v152_v16 }
 0x11a   : > { %v154_v24 = vpop.xlane.xlu0 %153 }
 0x11b   : > { %v162_v25 = vmul.f32 %v161_v23, %v154_v24 }
 0x11d   : > { %332 = vrsqrt.f32 %v162_v25  ;;  %vm169_vm3 = vweird.f32 %v162_v25 }
 0x123   : > { %v333_v26 = vpop.eup %332 }
 0x124   : > { %v164_v27 = vmul.f32 %v333_v26, %v162_v25  ;;  %vm170_vm2 = vweird.f32 %v333_v26 }
 0x125   : > { %vm171_vm4 = vmor %vm169_vm3, %vm170_vm2 }
 0x126   : > { %v165_v28 = vmul.f32 %v333_v26, %v164_v27 }
 0x128   : > { %v166_v29 = vmul.f32 0.5, %v165_v28 }
 0x12a   : > { %v167_v30 = vsub.f32 1.5, %v166_v29 }
 0x12c   : > { %v168_v31 = vmul.f32 %v333_v26, %v167_v30 }
 0x12e   : > { %v172_v32 = vsel %vm171_vm4, %v333_v26, %v168_v31 }
 0x12f   : > { %v173_v33 = vmul.f32 %v172_v32, %v148_v12  ;;  %v174_v34 = vmul.f32 %v172_v32, %v149_v13 }
 0x131   : > { %175 = vst [vmem:[%s134_s26] sm:$0xff] %v173_v33 }
 0x132   : > { %176 = vst [vmem:[%s134_s26 + $0x8] sm:$0xff] %v174_v34 }
 0x133   : > { %391 = shalt.err (!%p388_p4)
}
 0x134   : > { %282 = dma.vmem_to_hbm [thread:$0]  (%p494_p11), %s192_s27, 256, %s194_s28, %s178_s10  }
 0x135 PF: > { %s205_s13 = sand.u32 1, %s418_s6   ;;  %p582_p7 = scmp.ge.s32.totalorder %s430_s9, 2 }
 0x136   : > { %s206_s14 = scalar_lea.sflag [#allocation4], %s205_s13 }
 0x137   : > { %p289_p5 = pnand %p582_p7, %p498_p12 }
 0x139   : > { %p290_p8 = pneg %p289_p5 }
 0x13b   : > { %413 = dma.done.wait (%p290_p8), %s206_s14, 256  }
 0x13c   : > { %415 = vsyncadd (%p290_p8), %s206_s14, 4294967040  ;;  %p14_p10 = scmp.ge.s32.totalorder %s469_s12, 4   ;;  %s583_s6 = smov %s422_s7 }
 0x13d   : > { %s584_s7 = smov %s426_s8  ;;  %s585_s8 = smov %s481_s15 }
 0x13e   : > { %s586_s9 = smov %s469_s12  ;;  %16 = sbr.rel (!%p14_p10) target bundleno = 5 (0x5), region = 69 }
 0x143   :  { %212 = vsyncpa [#allocation3], 1 }
 0x144   :  { %214 = vsyncpa [#allocation3 + $0x1], 1 }
 0x145   :  { %215 = vsyncpa [#allocation4], 1 }
 0x146   :  { %217 = vsyncpa [#allocation4 + $0x1], 1 }

</bundles_post_ra>
